<compile_context>
chip_gen: v5e
topology: v5e:2x2
jax: 0.10.0
libtpu: 0.0.40
codegen_flags: <defaults>
</compile_context>

<pallas_src>
import jax
import jax.numpy as jnp
from jax.experimental import pallas as pl
from jax.experimental.pallas import tpu as pltpu

_LANE = 128
_TILE_ROWS = 2048  # 2048 x 128 f32 = 1 MiB per channel per tile


def _bgr_to_gray_kernel(x_ref, o_ref):
    # x_ref: (3, TR, 128) with channel order B, G, R;  o_ref: (TR, 128)
    b = x_ref[0]
    g = x_ref[1]
    r = x_ref[2]
    o_ref[...] = (0.299 * r + 0.587 * g + 0.11 * b).astype(o_ref.dtype)


def bgr_to_grayscale(x: jax.Array, *, tile_rows: int = _TILE_ROWS) -> jax.Array:
    """x: (B, 3, H, W) BGR image -> (B, 1, H, W) grayscale."""
    assert x.ndim == 4 and x.shape[1] == 3, f"expected (B,3,H,W), got {x.shape}"
    B, _, H, W = x.shape
    P = H * W

    # Lane-dense layout: pad the flattened pixel axis only up to the next
    # multiple of 128 (zero-copy when P is already lane-aligned).
    rows = pl.cdiv(P, _LANE)
    p_pad = rows * _LANE

    xf = x.reshape(B, 3, P)
    if p_pad != P:
        xf = jnp.pad(xf, ((0, 0), (0, 0), (0, p_pad - P)))
    x4 = xf.reshape(B, 3, rows, _LANE)

    if rows <= tile_rows:
        # Single tile: block == full array extent (any row count is legal).
        tr = rows
        n_tiles = 1
    else:
        # Multi-tile: tr is a multiple of 8, so blocks are (8,128)-aligned;
        # the last (possibly partial) tile is masked by Pallas automatically.
        tr = tile_rows
        n_tiles = pl.cdiv(rows, tr)

    itemsize = jnp.dtype(x.dtype).itemsize
    cost = pl.CostEstimate(
        flops=5 * B * H * W,                       # 3 muls + 2 adds per pixel
        transcendentals=0,
        bytes_accessed=(3 + 1) * B * H * W * itemsize,
    )

    out4 = pl.pallas_call(
        _bgr_to_gray_kernel,
        out_shape=jax.ShapeDtypeStruct((B, 1, rows, _LANE), x.dtype),
        grid_spec=pltpu.PrefetchScalarGridSpec(
            num_scalar_prefetch=0,
            grid=(B, n_tiles),
            in_specs=[
                pl.BlockSpec(
                    (pl.Squeezed(), 3, tr, _LANE),
                    lambda b, t: (b, 0, t, 0),
                ),
            ],
            out_specs=pl.BlockSpec(
                (pl.Squeezed(), pl.Squeezed(), tr, _LANE),
                lambda b, t: (b, 0, t, 0),
            ),
        ),
        compiler_params=pltpu.CompilerParams(
            dimension_semantics=("parallel", "parallel"),
            vmem_limit_bytes=32 * 1024 * 1024,
        ),
        cost_estimate=cost,
    )(x4)

    out = out4.reshape(B, 1, p_pad)
    if p_pad != P:
        out = out[:, :, :P]
    return out.reshape(B, 1, H, W)


def bgr_to_grayscale_ref(x: jax.Array) -> jax.Array:
    b = x[:, 0:1]
    g = x[:, 1:2]
    r = x[:, 2:3]
    return 0.299 * r + 0.587 * g + 0.11 * b


if __name__ == "__main__":
    key = jax.random.PRNGKey(0)

    # Main test: small NCHW BGR image, values in (0, 1). P = 256 -> no pad,
    # single full-extent tile.
    x = jax.random.uniform(key, (2, 3, 16, 16), dtype=jnp.float32)
    out = bgr_to_grayscale(x)
    jax.block_until_ready(out)
    ref = bgr_to_grayscale_ref(x)
    assert out.shape == (2, 1, 16, 16), out.shape
    assert jnp.allclose(out, ref, atol=1e-6, rtol=1e-6), "mismatch vs reference"

    # Ragged spatial size (exercises the <128-lane pad/unpad path).
    key2 = jax.random.fold_in(key, 1)
    x2 = jax.random.uniform(key2, (1, 3, 5, 7), dtype=jnp.float32)
    out2 = bgr_to_grayscale(x2)
    jax.block_until_ready(out2)
    ref2 = bgr_to_grayscale_ref(x2)
    assert out2.shape == (1, 1, 5, 7), out2.shape
    assert jnp.allclose(out2, ref2, atol=1e-6, rtol=1e-6), "mismatch (ragged) vs ref"

    # Multi-tile path with a partial boundary tile (rows=36, tile_rows=8 ->
    # 5 tiles, last one half full), still lane-aligned so zero-copy wrapper.
    key3 = jax.random.fold_in(key, 2)
    x3 = jax.random.uniform(key3, (1, 3, 36, 128), dtype=jnp.float32)
    out3 = bgr_to_grayscale(x3, tile_rows=8)
    jax.block_until_ready(out3)
    ref3 = bgr_to_grayscale_ref(x3)
    assert out3.shape == (1, 1, 36, 128), out3.shape
    assert jnp.allclose(out3, ref3, atol=1e-6, rtol=1e-6), "mismatch (tiled) vs ref"

    print("KERNEL_OK")
</pallas_src>

<mosaic_0001>
module attributes {stable_mosaic.version = 11 : i64} {
  func.func @_bgr_to_gray_kernel(%arg0: i32, %arg1: i32, %arg2: memref<1x3x2x128xf32, #tpu.memory_space<vmem>>, %arg3: memref<1x1x2x128xf32, #tpu.memory_space<vmem>>) attributes {dimension_semantics = [#tpu.dimension_semantics<parallel>, #tpu.dimension_semantics<parallel>], iteration_bounds = array<i64: 2, 1>, scalar_prefetch = 0 : i64, scratch_operands = 0 : i64, tpu.core_type = #tpu.core_type<tc>, window_params = [{transform_indices = @transform_0, window_bounds = array<i64: 1, 3, 2, 128>}, {transform_indices = @transform_1, window_bounds = array<i64: 1, 1, 2, 128>}]} {
    %c0 = arith.constant 0 : index
    %c0_0 = arith.constant 0 : index
    %c0_1 = arith.constant 0 : index
    %c0_2 = arith.constant 0 : index
    %0 = vector.load %arg2[%c0, %c0_0, %c0_1, %c0_2] : memref<1x3x2x128xf32, #tpu.memory_space<vmem>>, vector<1x1x2x128xf32>
    %1 = vector.shape_cast %0 : vector<1x1x2x128xf32> to vector<2x128xf32>
    %c0_3 = arith.constant 0 : index
    %c1 = arith.constant 1 : index
    %c0_4 = arith.constant 0 : index
    %c0_5 = arith.constant 0 : index
    %2 = vector.load %arg2[%c0_3, %c1, %c0_4, %c0_5] : memref<1x3x2x128xf32, #tpu.memory_space<vmem>>, vector<1x1x2x128xf32>
    %3 = vector.shape_cast %2 : vector<1x1x2x128xf32> to vector<2x128xf32>
    %c0_6 = arith.constant 0 : index
    %c2 = arith.constant 2 : index
    %c0_7 = arith.constant 0 : index
    %c0_8 = arith.constant 0 : index
    %4 = vector.load %arg2[%c0_6, %c2, %c0_7, %c0_8] : memref<1x3x2x128xf32, #tpu.memory_space<vmem>>, vector<1x1x2x128xf32>
    %5 = vector.shape_cast %4 : vector<1x1x2x128xf32> to vector<2x128xf32>
    %cst = arith.constant 2.990000e-01 : f32
    %6 = vector.broadcast %cst : f32 to vector<2x128xf32>
    %7 = arith.mulf %6, %5 : vector<2x128xf32>
    %cst_9 = arith.constant 5.870000e-01 : f32
    %8 = vector.broadcast %cst_9 : f32 to vector<2x128xf32>
    %9 = arith.mulf %8, %3 : vector<2x128xf32>
    %10 = arith.addf %7, %9 : vector<2x128xf32>
    %cst_10 = arith.constant 1.100000e-01 : f32
    %11 = vector.broadcast %cst_10 : f32 to vector<2x128xf32>
    %12 = arith.mulf %11, %1 : vector<2x128xf32>
    %13 = arith.addf %10, %12 : vector<2x128xf32>
    %c0_11 = arith.constant 0 : index
    %c0_12 = arith.constant 0 : index
    %c0_13 = arith.constant 0 : index
    %c0_14 = arith.constant 0 : index
    %14 = vector.load %arg3[%c0_11, %c0_12, %c0_13, %c0_14] : memref<1x1x2x128xf32, #tpu.memory_space<vmem>>, vector<1x1x2x128xf32>
    %15 = vector.shape_cast %14 : vector<1x1x2x128xf32> to vector<2x128xf32>
    %16 = vector.shape_cast %13 : vector<2x128xf32> to vector<1x1x2x128xf32>
    tpu.vector_store %arg3[%c0_11, %c0_12, %c0_13, %c0_14], %16 {strides = array<i32>} : memref<1x1x2x128xf32, #tpu.memory_space<vmem>>, vector<1x1x2x128xf32>,
    return
  }
  func.func @transform_0(%arg0: i32, %arg1: i32) -> (i32, i32, i32, i32) {
    %c0_i32 = arith.constant 0 : i32
    %c0_i32_0 = arith.constant 0 : i32
    %c0_i32_1 = arith.constant 0 : i32
    return %arg0, %c0_i32, %arg1, %c0_i32_0 : i32, i32, i32, i32
  }
  func.func @transform_1(%arg0: i32, %arg1: i32) -> (i32, i32, i32, i32) {
    %c0_i32 = arith.constant 0 : i32
    %c0_i32_0 = arith.constant 0 : i32
    %c0_i32_1 = arith.constant 0 : i32
    return %arg0, %c0_i32, %arg1, %c0_i32_0 : i32, i32, i32, i32
  }
}

</mosaic_0001>

<bundles_post_ra>
// kernel: tpu_custom_call.1
= control target key start
LH: loop header
LB: loop body
LE: loop exit
PB: predicated region body
PF: predicated region fallthrough
CT: control target
= control target key end

     0   :  { %6 = vsyncpa [#allocation3], 0  ;;  %s590_s0 = inlined_call_operand.hbm [shape: f32[2,3,2,128], index: 0, kind: input, shape index: {}]   ;;  %s591_s1 = inlined_call_operand.hbm [shape: f32[2,1,2,128], index: 1, kind: output, shape index: {}]  }
   0x1   :  { %8 = vsyncpa [#allocation3 + $0x1], 0 }
   0x2   :  { %9 = vsyncpa [#allocation4], 0 }
   0x3   :  { %11 = vsyncpa [#allocation4 + $0x1], 0  ;;  %s469_s6 = smov 0   ;;  %s471_s7 = smov 0  }
   0x4   :  { %s473_s8 = smov 0   ;;  %s475_s9 = smov 0  }
   0x5   :  { %s477_s10 = smov 0   ;;  %s479_s11 = smov 0  }
   0x6 LB: > { %s263_s12 = sadd.s32 4294967295, %s455_s11   ;;  %s264_s13 = sadd.s32 4294967294, %s455_s11   ;;  %s455_s11 = sphi %s479_s11, %s17_s11   ;;  %s451_s10 = sphi %s477_s10, %s600_s10   ;;  %s447_s9 = sphi %s475_s9, %s599_s9   ;;  %s443_s8 = sphi %s473_s8, %s598_s8   ;;  %s439_s7 = sphi %s471_s7, %s597_s7   ;;  %s435_s6 = sphi %s469_s6, %s596_s6  }
   0x7   : > { %s29_s14 = sadd.s32 1, %s451_s10  ;;  %s38_s15 = sadd.s32 1, %s443_s8 }
   0x8   : > { %p31_p0 = scmp.ge.s32.totalorder %s29_s14, 2  ;;  %p45_p1 = scmp.ne.s32.totalorder %s443_s8, %s439_s7 }
   0x9   : > { %p46_p2 = scmp.eq.s32.totalorder %s455_s11, 0  ;;  %p51_p3 = scmp.ne.s32.totalorder %s439_s7, %s435_s6 }
   0xa   : > { %s602_s14 = smov (%p31_p0, %s29_s14), 0  ;;  %p52_p5 = scmp.eq.s32.totalorder %s263_s12, 0 }
   0xb   : > { %p510_p4 = por %p46_p2, %p45_p1  ;;  %s33_s17 = ssub.s32 %s451_s10, %s602_s14 }
   0xc   : > { %p77_p6 = scmp.eq.s32.totalorder %s263_s12, 1  ;;  %p36_p7 = scmp.eq.s32.totalorder %s33_s17, 0 }
   0xd   : > { %p516_p8 = por %p52_p5, %p51_p3  ;;  %p83_p10 = scmp.eq.s32.totalorder %s264_s13, 1 }
   0xe   : > { %p520_p9 = por %p77_p6, %p45_p1  ;;  %p266_p12 = scmp.ge.s32.totalorder %s455_s11, 2 }
   0xf   : > { %s525_s20 = scalar_select %p36_p7, %s443_s8, %s38_s15  }
  0x10   : > { %p527_p11 = por %p83_p10, %p51_p3  ;;  %p291_p13 = scmp.lt.s32.totalorder %s455_s11, 2 }
  0x11   : > { %s103_s22 = sand.u32 1, %s443_s8   ;;  %s277_s24 = smul.u32 6, %s451_s10 }
  0x12   : > { %s276_s23 = smul.u32 6, %s103_s22  ;;  %p284_p0 = pnand %p291_p13, %p510_p4 }
  0x13   : > { %s113_s27 = scalar_lea.hbm %s590_s0, %s277_s24  ;;  %p268_p1 = scmp.ge.s32.totalorder %s455_s11, 1 }
  0x14   : > { %s107_s28 = scalar_lea.vmem [#allocation2], %s276_s23  ;;  %s114_s30 = sshll.u32 %s113_s27, 4  ;;  %s115_s30 = int_to_ptr.hbm [resolvable:$true] %s114_s30 }
  0x15   : > { %s116_s29 = sshll.u32 %s107_s28, 4  ;;  %s104_s2 = scalar_lea.sflag [#allocation3], %s103_s22  ;;  %s117_s29 = int_to_ptr.vmem [resolvable:$true] %s116_s29 }
  0x16   : > { %s457_s3 = smov 32   ;;  %s458_s4 = smov 2  }
  0x17   : > { %286 = dma.hbm_to_vmem [thread:$0]  (!%p284_p0), %s115_s30, 96, %s117_s29, %s104_s2, %s457_s3, %s457_s3, %s458_s4  }
  0x18   : > { %p124_p2 = scmp.lt.s32.totalorder %s455_s11, 3 }
  0x1a   : > { %p125_p3 = pnand %p268_p1, %p124_p2 }
  0x1b   : > { %s543_s5 = sand.u32 (!%p125_p3), 1, %s439_s7  }
  0x1c   : > { %128 = sbr.rel (%p125_p3) target bundleno = 50 (0x32), region = 24  ;;  %s131_s13 = scalar_lea.sflag (!%p125_p3), [#allocation3], %s543_s5 }
  0x1d   : > { %s278_s12 = smul.u32 (!%p125_p3), 6, %s543_s5 }
  0x1f   : > { %s134_s15 = scalar_lea.vmem (!%p125_p3), [#allocation2], %s278_s12 }
  0x21   : > { %426 = dma.done.wait (%p516_p8), %s131_s13, 96  }
  0x22   : > { %428 = vsyncadd (%p516_p8), %s131_s13, 4294967200  ;;  %s269_s16 = sshll.u32 %s543_s5, 1  ;;  %s273_s17 = sshll.u32 %s447_s9, 1  ;;  %v154_v0 = vld [vmem:[%s134_s15] sm:$0x3] }
  0x23   : > { %s177_s24 = scalar_lea.hbm %s591_s1, %s273_s17  ;;  %v270_v1 = vld [vmem:[%s134_s15 + $0x2] sm:$0x3]  ;;  %v271_v2 = vld [vmem:[%s134_s15 + $0x4] sm:$0x3]  ;;  %v162_v5 = vmul.f32 0.11, %v154_v0 }
  0x24   : > { %v159_v3 = vmul.f32 0.299, %v271_v2  ;;  %v160_v4 = vmul.f32 0.587, %v270_v1  ;;  %s153_s25 = scalar_lea.vmem [#allocation5], %s269_s16  ;;  %s181_s18 = sshll.u32 %s177_s24, 4  ;;  %s182_s18 = int_to_ptr.hbm [resolvable:$true] %s181_s18 }
  0x25   : > { %s179_s26 = sshll.u32 %s153_s25, 4  ;;  %s166_s9 = scalar_lea.sflag [#allocation4], %s543_s5  ;;  %s180_s26 = int_to_ptr.vmem [resolvable:$true] %s179_s26 }
  0x26   : > { %v161_v6 = vadd.f32 %v160_v4, %v159_v3  ;;  %s387_s27 = sshra.s32 %s182_s18, 4  ;;  %s393_s2 = scalar_lea.hbm %s591_s1, 4  ;;  %s388_s27 = int_to_ptr.hbm [resolvable:$true] %s387_s27 }
  0x27   : > { %s389_s28 = scalar_lea.hbm %s388_s27, 2  ;;  %p394_p7 = scmp.lt.s32.totalorder %s388_s27, %s591_s1 }
  0x28   : > { %v163_v7 = vadd.f32 %v162_v5, %v161_v6  ;;  %p390_p4 = scmp.ne.s32.totalorder %s388_s27, %s389_s28  ;;  %p395_p8 = scmp.lt.s32.totalorder %s393_s2, %s389_s28 }
  0x2a   : > { %164 = vst [vmem:[%s153_s25] sm:$0x3] %v163_v7  ;;  %p391_p5 = pnand %p390_p4, %p520_p9  ;;  %p396_p10 = por %p395_p8, %p394_p7 }
  0x2c   : > { %p392_p6 = pneg %p391_p5 }
  0x2e   : > { %p397_p13 = pnand %p396_p10, %p392_p6 }
  0x30   : > { %400 = shalt.err (!%p397_p13)
}
  0x31   : > { %281 = dma.vmem_to_hbm [thread:$0]  (%p520_p9), %s180_s26, 32, %s182_s18, %s166_s9  }
  0x32 PF: > { %s193_s5 = sand.u32 1, %s435_s6   ;;  %p288_p0 = pnand %p266_p12, %p527_p11 }
  0x33   : > { %s194_s12 = scalar_lea.sflag [#allocation4], %s193_s5 }
  0x34   : > { %p289_p1 = pneg %p288_p0 }
  0x36   : > { %430 = dma.done.wait (%p289_p1), %s194_s12, 32  }
  0x37   : > { %432 = vsyncadd (%p289_p1), %s194_s12, 4294967264  ;;  %s17_s11 = sadd.s32 1, %s455_s11   ;;  %s596_s6 = smov %s439_s7 }
  0x38   : > { %p14_p2 = scmp.ge.s32.totalorder %s17_s11, 4   ;;  %s597_s7 = smov %s443_s8 }
  0x39   : > { %s598_s8 = smov %s525_s20  ;;  %s599_s9 = smov %s451_s10 }
  0x3a   : > { %s600_s10 = smov %s602_s14  ;;  %16 = sbr.rel (!%p14_p2) target bundleno = 6 (0x6), region = 71 }
  0x3f   :  { %200 = vsyncpa [#allocation3], 1 }
  0x40   :  { %202 = vsyncpa [#allocation3 + $0x1], 1 }
  0x41   :  { %203 = vsyncpa [#allocation4], 1 }
  0x42   :  { %205 = vsyncpa [#allocation4 + $0x1], 1 }

</bundles_post_ra>
